<compile_context>
chip_gen: v6e
topology: v6e:2x2x1
jax: 0.10.0
libtpu: 0.0.40
codegen_flags: <defaults>
</compile_context>

<pallas_src>
import functools

import jax
import jax.numpy as jnp
from jax import lax
from jax.experimental import pallas as pl
from jax.experimental.pallas import tpu as pltpu

EPS = 1e-5                     # PyTorch InstanceNorm2d default
LANE = 128                     # TPU lane width
SUB = 8                        # TPU sublane width
TK_MAX = 512                   # K-tile upper bound
TP_MAX = 256                   # spatial (P) tile upper bound (MXU row dim)
W_RESIDENT_BYTES = 8 << 20     # keep packed weights VMEM-resident below this


def _round_up(x, m):
    return (x + m - 1) // m * m


# ---------------------------------------------------------------------------
# Kernel 1: im2col matmul (conv + gate fused along lanes) + per-tile stats.
# Grid = (N, P-tiles, K-tiles); K (reduction) innermost.
# ---------------------------------------------------------------------------
def _conv_stats_kernel(p_ref, w_ref, y_ref, stats_ref, acc_ref,
                       *, tk, w_resident):
    """
    p_ref    : (1, tp, tk)          bf16/f32 im2col patch tile
    w_ref    : (K_pad, 2*Cp) resident  OR  (tk, 2*Cp) tiled   packed weights
    y_ref    : (1, tp, 2*Cp)        pre-norm conv output (compute dtype)
    stats_ref: (1, 1, 8, 2*Cp) f32  rows 0/1 = per-tile sum / sum-of-squares
    acc_ref  : (tp, 2*Cp) f32       matmul accumulator (VMEM scratch)
    """
    k = pl.program_id(2)

    if w_resident:
        start = pl.multiple_of(k * tk, LANE)
        w = w_ref[pl.ds(start, tk), :]
    else:
        w = w_ref[...]

    prod = jnp.dot(p_ref[0], w, preferred_element_type=jnp.float32)

    @pl.when(k == 0)
    def _():
        acc_ref[...] = prod                 # direct write, no zero-fill pass

    @pl.when(k > 0)
    def _():
        acc_ref[...] += prod

    @pl.when(k == pl.num_programs(2) - 1)
    def _():
        y = acc_ref[...]                                    # (tp, 2*Cp) f32
        # Partial instance-norm statistics for this spatial tile.  Zero-padded
        # rows contribute exactly zero; the true count is applied outside.
        s1 = jnp.sum(y, axis=0, keepdims=True)              # (1, 2*Cp)
        s2 = jnp.sum(y * y, axis=0, keepdims=True)          # (1, 2*Cp)
        pad_rows = jnp.zeros((6, s1.shape[-1]), jnp.float32)
        stats_ref[0, 0] = jnp.concatenate([s1, s2, pad_rows], axis=0)
        y_ref[0] = y.astype(y_ref.dtype)


# ---------------------------------------------------------------------------
# Kernel 2: folded instance-norm affine (scale/shift) + GLU gating.
# Grid = (N, P-tiles); both axes parallel (dual-TC on v7x even for N == 1).
# ---------------------------------------------------------------------------
def _norm_glu_kernel(y_ref, scale_ref, shift_ref, o_ref):
    """
    y_ref    : (1, tp, 2*Cp)  pre-norm conv output
    scale_ref: (1, 1, 2*Cp)   f32 gamma * inv_std        (per batch, channel)
    shift_ref: (1, 1, 2*Cp)   f32 beta - mean * scale
    o_ref    : (1, tp, Cp)    gated output (compute dtype)
    """
    y = y_ref[0].astype(jnp.float32)                        # (tp, 2*Cp)
    yn = y * scale_ref[0] + shift_ref[0]
    cp = o_ref.shape[-1]
    h = yn[:, :cp]                       # lane-aligned split (Cp % 128 == 0)
    g = yn[:, cp:]
    o_ref[0] = (h * jax.nn.sigmoid(g)).astype(o_ref.dtype)


def _im2col(x, kh, kw, stride, pad):
    """x: (N, Cin, H, W) -> (N, HO*WO, Cin*KH*KW), cin-major / (kh,kw)-minor."""
    N, Cin, H, W = x.shape
    HO = (H + 2 * pad - kh) // stride + 1
    WO = (W + 2 * pad - kw) // stride + 1
    xp = jnp.pad(x, ((0, 0), (0, 0), (pad, pad), (pad, pad)))
    cols = []
    for i in range(kh):
        for j in range(kw):
            cols.append(xp[:, :, i:i + stride * HO:stride,
                              j:j + stride * WO:stride])    # (N, Cin, HO, WO)
    p = jnp.stack(cols, axis=2)                             # (N, Cin, KH*KW, HO, WO)
    p = p.transpose(0, 3, 4, 1, 2).reshape(N, HO * WO, Cin * kh * kw)
    return p, HO, WO


@functools.partial(jax.jit,
                   static_argnames=("kernel_size", "stride", "padding",
                                    "compute_dtype", "channels_last"))
def down_sample_generator(x, params, *, kernel_size, stride, padding,
                          compute_dtype=jnp.bfloat16, channels_last=False):
    """x: (N, Cin, H, W) NCHW -> (N, Cout, HO, WO) NCHW (compute_dtype)."""
    kh = kw = kernel_size
    w1, g1, be1 = params["w1"], params["gamma1"], params["beta1"]
    w2, g2, be2 = params["w2"], params["gamma2"], params["beta2"]
    # Conv bias (params["b1"/"b2"]) is intentionally unused: a per-channel
    # constant before InstanceNorm is exactly cancelled by the mean
    # subtraction and does not change the variance.
    Cout, Cin, _, _ = w1.shape
    N = x.shape[0]

    # TODO(synk): replace the materialized im2col with in-kernel DMA gather of
    # the kh*kw shifted windows (biggest lever on v5e's HBM bandwidth).
    patches, HO, WO = _im2col(x.astype(compute_dtype), kh, kw, stride, padding)
    P = HO * WO
    K = Cin * kh * kw

    # ---- lane/sublane-dense padding and tiling -----------------------------
    Cp = _round_up(Cout, LANE)               # output channels -> lane multiple
    K_pad = _round_up(K, LANE)               # contraction dim -> 128 only
    if K_pad <= TK_MAX:
        tk = K_pad
    else:
        tk = next(t for t in (512, 384, 256, 128) if K_pad % t == 0)
    kt = K_pad // tk

    pt = -(-P // TP_MAX)                     # number of spatial tiles
    tp = _round_up(-(-P // pt), SUB)         # sublane-aligned tile height
    P_pad = pt * tp

    patches = jnp.pad(patches, ((0, 0), (0, P_pad - P), (0, K_pad - K)))

    def prep_w(w):  # (Cout, Cin, KH, KW) -> (K_pad, Cp); matches im2col order
        wm = w.reshape(Cout, K).T                            # (K, Cout)
        return jnp.pad(wm, ((0, K_pad - K), (0, Cp - Cout)))

    w_cat = jnp.concatenate([prep_w(w1), prep_w(w2)], axis=1).astype(compute_dtype)

    def pad_c(a, value=0.0):
        return jnp.pad(a, (0, Cp - Cout), constant_values=value)

    gam_cat = jnp.concatenate([pad_c(g1, 1.0), pad_c(g2, 1.0)]).astype(jnp.float32)
    bet_cat = jnp.concatenate([pad_c(be1), pad_c(be2)]).astype(jnp.float32)

    itemsize = jnp.dtype(compute_dtype).itemsize
    w_resident = (K_pad * 2 * Cp * itemsize) <= W_RESIDENT_BYTES
    if w_resident:
        w_spec = pl.BlockSpec((K_pad, 2 * Cp), lambda n, p, k: (0, 0))
        w_bytes = 2 * K_pad * 2 * Cp * itemsize
    else:
        w_spec = pl.BlockSpec((tk, 2 * Cp), lambda n, p, k: (k, 0))
        w_bytes = 2 * tk * 2 * Cp * itemsize

    # ---- accurate VMEM budget (+headroom, conservative cap for v7x) --------
    vmem1 = (2 * tp * tk * itemsize                 # patches, double-buffered
             + w_bytes                              # packed weights
             + 2 * tp * 2 * Cp * itemsize           # y output, double-buffered
             + 2 * 8 * 2 * Cp * 4                   # stats output
             + tp * 2 * Cp * 4)                     # f32 accumulator scratch
    vmem1 = int(min(max(vmem1 + (4 << 20), 16 << 20), 56 << 20))

    kernel1 = functools.partial(_conv_stats_kernel, tk=tk, w_resident=w_resident)
    y, stats = pl.pallas_call(
        kernel1,
        out_shape=(jax.ShapeDtypeStruct((N, P_pad, 2 * Cp), compute_dtype),
                   jax.ShapeDtypeStruct((N, pt, 8, 2 * Cp), jnp.float32)),
        grid=(N, pt, kt),
        in_specs=[
            pl.BlockSpec((1, tp, tk), lambda n, p, k: (n, p, k)),
            w_spec,
        ],
        out_specs=(
            pl.BlockSpec((1, tp, 2 * Cp), lambda n, p, k: (n, p, 0)),
            pl.BlockSpec((1, 1, 8, 2 * Cp), lambda n, p, k: (n, p, 0, 0)),
        ),
        scratch_shapes=[pltpu.VMEM((tp, 2 * Cp), jnp.float32)],
        compiler_params=pltpu.CompilerParams(
            dimension_semantics=("parallel", "parallel", "arbitrary"),
            vmem_limit_bytes=vmem1),
    )(patches, w_cat)

    # ---- tiny (N, 2*Cp) stat finishing: fold affine into scale/shift -------
    s1 = jnp.sum(stats[:, :, 0, :], axis=1)                  # (N, 2*Cp)
    s2 = jnp.sum(stats[:, :, 1, :], axis=1)
    inv_p = 1.0 / P                                          # true spatial size
    mean = s1 * inv_p
    var = jnp.maximum(s2 * inv_p - mean * mean, 0.0)
    inv_std = lax.rsqrt(var + EPS)
    scale = gam_cat[None, :] * inv_std                       # (N, 2*Cp)
    shift = bet_cat[None, :] - mean * scale
    scale = scale[:, None, :]                                # (N, 1, 2*Cp)
    shift = shift[:, None, :]

    vmem2 = (2 * tp * 2 * Cp * itemsize                      # y input
             + 2 * tp * Cp * itemsize                        # output
             + 4 * 2 * Cp * 4)                               # scale/shift
    vmem2 = int(min(max(vmem2 + (4 << 20), 16 << 20), 56 << 20))

    out = pl.pallas_call(
        _norm_glu_kernel,
        out_shape=jax.ShapeDtypeStruct((N, P_pad, Cp), compute_dtype),
        grid=(N, pt),
        in_specs=[
            pl.BlockSpec((1, tp, 2 * Cp), lambda n, p: (n, p, 0)),
            pl.BlockSpec((1, 1, 2 * Cp), lambda n, p: (n, 0, 0)),
            pl.BlockSpec((1, 1, 2 * Cp), lambda n, p: (n, 0, 0)),
        ],
        out_specs=pl.BlockSpec((1, tp, Cp), lambda n, p: (n, p, 0)),
        compiler_params=pltpu.CompilerParams(
            dimension_semantics=("parallel", "parallel"),
            vmem_limit_bytes=vmem2),
    )(y, scale, shift)

    out = out[:, :P, :Cout].reshape(N, HO, WO, Cout)         # drop pads -> NHWC
    if channels_last:
        return out                                           # NHWC
    return out.transpose(0, 3, 1, 2)                         # NCHW (PyTorch parity)


def _reference(x, params, *, kernel_size, stride, padding):
    """Plain-JAX fp32 reference (conv + bias + instance norm + GLU)."""
    def conv(x, w, b):
        y = lax.conv_general_dilated(
            x, w, window_strides=(stride, stride),
            padding=[(padding, padding), (padding, padding)],
            dimension_numbers=("NCHW", "OIHW", "NCHW"))
        return y + b[None, :, None, None]

    def inorm(y, gamma, beta):
        mean = jnp.mean(y, axis=(2, 3), keepdims=True)
        var = jnp.mean((y - mean) ** 2, axis=(2, 3), keepdims=True)
        yn = (y - mean) * lax.rsqrt(var + EPS)
        return yn * gamma[None, :, None, None] + beta[None, :, None, None]

    h = inorm(conv(x, params["w1"], params["b1"]), params["gamma1"], params["beta1"])
    g = inorm(conv(x, params["w2"], params["b2"]), params["gamma2"], params["beta2"])
    return h * jax.nn.sigmoid(g)


def make_params(key, in_channels, out_channels, kernel_size):
    ks = jax.random.split(key, 8)
    shape_w = (out_channels, in_channels, kernel_size, kernel_size)
    return {
        "w1": 0.1 * jax.random.normal(ks[0], shape_w, jnp.float32),
        "b1": 0.1 * jax.random.normal(ks[1], (out_channels,), jnp.float32),
        "w2": 0.1 * jax.random.normal(ks[2], shape_w, jnp.float32),
        "b2": 0.1 * jax.random.normal(ks[3], (out_channels,), jnp.float32),
        "gamma1": 1.0 + 0.1 * jax.random.normal(ks[4], (out_channels,), jnp.float32),
        "beta1": 0.1 * jax.random.normal(ks[5], (out_channels,), jnp.float32),
        "gamma2": 1.0 + 0.1 * jax.random.normal(ks[6], (out_channels,), jnp.float32),
        "beta2": 0.1 * jax.random.normal(ks[7], (out_channels,), jnp.float32),
    }


if __name__ == "__main__":
    # Small shapes consistent with the module: NCHW input, conv downsample by 2.
    N, Cin, H, W = 2, 4, 16, 16
    Cout, kernel_size, stride, padding = 8, 3, 2, 1

    key = jax.random.PRNGKey(0)
    kx, kp = jax.random.split(key)
    x = jax.random.normal(kx, (N, Cin, H, W), jnp.float32)
    params = make_params(kp, Cin, Cout, kernel_size)

    ref = _reference(x, params, kernel_size=kernel_size,
                     stride=stride, padding=padding)

    # fp32 matmul path: tight numerical check of the kernel math (also checks
    # that dropping the conv bias is exactly cancelled by the instance norm).
    out_f32 = down_sample_generator(x, params, kernel_size=kernel_size,
                                    stride=stride, padding=padding,
                                    compute_dtype=jnp.float32)
    out_f32 = jax.block_until_ready(out_f32)
    assert out_f32.shape == ref.shape == (N, Cout, H // 2, W // 2), out_f32.shape
    assert jnp.allclose(out_f32, ref, atol=1e-4, rtol=1e-4), float(
        jnp.max(jnp.abs(out_f32 - ref)))

    # bf16 path (default / performance mode): bf16-appropriate tolerance.
    out_bf16 = down_sample_generator(x, params, kernel_size=kernel_size,
                                     stride=stride, padding=padding)
    out_bf16 = jax.block_until_ready(out_bf16).astype(jnp.float32)
    assert out_bf16.shape == ref.shape
    assert jnp.allclose(out_bf16, ref, atol=7.5e-2, rtol=7.5e-2), float(
        jnp.max(jnp.abs(out_bf16 - ref)))

    print("KERNEL_OK")
</pallas_src>

<mosaic_0001>
module attributes {stable_mosaic.version = 11 : i64} {
  func.func @_conv_stats_kernel(%arg0: i32, %arg1: i32, %arg2: i32, %arg3: memref<1x64x128xf32, #tpu.memory_space<vmem>>, %arg4: memref<128x256xf32, #tpu.memory_space<vmem>>, %arg5: memref<1x64x256xf32, #tpu.memory_space<vmem>>, %arg6: memref<1x1x8x256xf32, #tpu.memory_space<vmem>>, %arg7: memref<64x256xf32, #tpu.memory_space<vmem>>) attributes {dimension_semantics = [#tpu.dimension_semantics<parallel>, #tpu.dimension_semantics<parallel>, #tpu.dimension_semantics<arbitrary>], iteration_bounds = array<i64: 2, 1, 1>, scalar_prefetch = 0 : i64, scratch_operands = 1 : i64, tpu.core_type = #tpu.core_type<tc>, window_params = [{transform_indices = @transform_0, window_bounds = array<i64: 1, 64, 128>}, {pipeline_mode = #tpu.pipeline_mode<synchronous>, transform_indices = @transform_1, window_bounds = array<i64: 128, 256>}, {transform_indices = @transform_2, window_bounds = array<i64: 1, 64, 256>}, {transform_indices = @transform_3, window_bounds = array<i64: 1, 1, 8, 256>}]} {
    %c128_i32 = arith.constant 128 : i32
    %0 = arith.muli %arg2, %c128_i32 : i32
    %1 = tpu.assume_multiple %0, 128 : i32
    %2 = arith.index_cast %1 : i32 to index
    %c0 = arith.constant 0 : index
    %3 = vector.load %arg4[%2, %c0] : memref<128x256xf32, #tpu.memory_space<vmem>>, vector<128x256xf32>
    %c0_0 = arith.constant 0 : index
    %c0_1 = arith.constant 0 : index
    %c0_2 = arith.constant 0 : index
    %4 = vector.load %arg3[%c0_0, %c0_1, %c0_2] : memref<1x64x128xf32, #tpu.memory_space<vmem>>, vector<1x64x128xf32>
    %5 = vector.shape_cast %4 : vector<1x64x128xf32> to vector<64x128xf32>
    %cst = arith.constant dense<0.000000e+00> : vector<64x256xf32>
    %6 = tpu.matmul %5, %3, %cst {dimension_numbers = #tpu.dot_dimension_numbers<[1], [0], [0], [1], [0, 0, 1, 1], [], []>} : vector<64x128xf32>, vector<128x256xf32>, vector<64x256xf32> -> vector<64x256xf32>
    %c0_i32 = arith.constant 0 : i32
    %7 = arith.cmpi eq, %arg2, %c0_i32 : i32
    %8 = arith.extui %7 : i1 to i32
    %c0_i32_3 = arith.constant 0 : i32
    %9 = arith.cmpi ne, %8, %c0_i32_3 : i32
    scf.if %9 {
      %c0_8 = arith.constant 0 : index
      %c0_9 = arith.constant 0 : index
      %16 = vector.load %arg7[%c0_8, %c0_9] : memref<64x256xf32, #tpu.memory_space<vmem>>, vector<64x256xf32>
      tpu.vector_store %arg7[%c0_8, %c0_9], %6 {strides = array<i32>} : memref<64x256xf32, #tpu.memory_space<vmem>>, vector<64x256xf32>,
    } else {
    }
    %c0_i32_4 = arith.constant 0 : i32
    %10 = arith.cmpi sgt, %arg2, %c0_i32_4 : i32
    %11 = arith.extui %10 : i1 to i32
    %c0_i32_5 = arith.constant 0 : i32
    %12 = arith.cmpi ne, %11, %c0_i32_5 : i32
    scf.if %12 {
      %c0_8 = arith.constant 0 : index
      %c0_9 = arith.constant 0 : index
      %16 = vector.load %arg7[%c0_8, %c0_9] : memref<64x256xf32, #tpu.memory_space<vmem>>, vector<64x256xf32>
      %17 = arith.addf %16, %6 : vector<64x256xf32>
      %c0_10 = arith.constant 0 : index
      %c0_11 = arith.constant 0 : index
      %18 = vector.load %arg7[%c0_10, %c0_11] : memref<64x256xf32, #tpu.memory_space<vmem>>, vector<64x256xf32>
      tpu.vector_store %arg7[%c0_10, %c0_11], %17 {strides = array<i32>} : memref<64x256xf32, #tpu.memory_space<vmem>>, vector<64x256xf32>,
    } else {
    }
    %c0_i32_6 = arith.constant 0 : i32
    %13 = arith.cmpi eq, %arg2, %c0_i32_6 : i32
    %14 = arith.extui %13 : i1 to i32
    %c0_i32_7 = arith.constant 0 : i32
    %15 = arith.cmpi ne, %14, %c0_i32_7 : i32
    scf.if %15 {
      %c0_8 = arith.constant 0 : index
      %c0_9 = arith.constant 0 : index
      %16 = vector.load %arg7[%c0_8, %c0_9] : memref<64x256xf32, #tpu.memory_space<vmem>>, vector<64x256xf32>
      %cst_10 = arith.constant dense<0.000000e+00> : vector<256xf32>
      %17 = vector.multi_reduction <add>, %16, %cst_10 [0] : vector<64x256xf32> to vector<256xf32>
      %18 = vector.shape_cast %17 : vector<256xf32> to vector<1x256xf32>
      %19 = arith.mulf %16, %16 : vector<64x256xf32>
      %cst_11 = arith.constant dense<0.000000e+00> : vector<256xf32>
      %20 = vector.multi_reduction <add>, %19, %cst_11 [0] : vector<64x256xf32> to vector<256xf32>
      %21 = vector.shape_cast %20 : vector<256xf32> to vector<1x256xf32>
      %cst_12 = arith.constant 0.000000e+00 : f32
      %22 = vector.broadcast %cst_12 : f32 to vector<6x256xf32>
      %23 = tpu.concatenate %18, %21, %22 in 0 : vector<1x256xf32>, vector<1x256xf32>, vector<6x256xf32> -> vector<8x256xf32>
      %c0_13 = arith.constant 0 : index
      %c0_14 = arith.constant 0 : index
      %c0_15 = arith.constant 0 : index
      %c0_16 = arith.constant 0 : index
      %24 = vector.load %arg6[%c0_13, %c0_14, %c0_15, %c0_16] : memref<1x1x8x256xf32, #tpu.memory_space<vmem>>, vector<1x1x8x256xf32>
      %25 = vector.shape_cast %24 : vector<1x1x8x256xf32> to vector<8x256xf32>
      %26 = vector.shape_cast %23 : vector<8x256xf32> to vector<1x1x8x256xf32>
      tpu.vector_store %arg6[%c0_13, %c0_14, %c0_15, %c0_16], %26 {strides = array<i32>} : memref<1x1x8x256xf32, #tpu.memory_space<vmem>>, vector<1x1x8x256xf32>,
      %c0_17 = arith.constant 0 : index
      %c0_18 = arith.constant 0 : index
      %c0_19 = arith.constant 0 : index
      %27 = vector.load %arg5[%c0_17, %c0_18, %c0_19] : memref<1x64x256xf32, #tpu.memory_space<vmem>>, vector<1x64x256xf32>
      %28 = vector.shape_cast %27 : vector<1x64x256xf32> to vector<64x256xf32>
      %29 = vector.shape_cast %16 : vector<64x256xf32> to vector<1x64x256xf32>
      tpu.vector_store %arg5[%c0_17, %c0_18, %c0_19], %29 {strides = array<i32>} : memref<1x64x256xf32, #tpu.memory_space<vmem>>, vector<1x64x256xf32>,
    } else {
    }
    return
  }
  func.func @transform_0(%arg0: i32, %arg1: i32, %arg2: i32) -> (i32, i32, i32) {
    %c0_i32 = arith.constant 0 : i32
    return %arg0, %arg1, %arg2 : i32, i32, i32
  }
  func.func @transform_1(%arg0: i32, %arg1: i32, %arg2: i32) -> (i32, i32) {
    %c0_i32 = arith.constant 0 : i32
    %c0_i32_0 = arith.constant 0 : i32
    %c0_i32_1 = arith.constant 0 : i32
    return %c0_i32, %c0_i32_0 : i32, i32
  }
  func.func @transform_2(%arg0: i32, %arg1: i32, %arg2: i32) -> (i32, i32, i32) {
    %c0_i32 = arith.constant 0 : i32
    %c0_i32_0 = arith.constant 0 : i32
    return %arg0, %arg1, %c0_i32 : i32, i32, i32
  }
  func.func @transform_3(%arg0: i32, %arg1: i32, %arg2: i32) -> (i32, i32, i32, i32) {
    %c0_i32 = arith.constant 0 : i32
    %c0_i32_0 = arith.constant 0 : i32
    %c0_i32_1 = arith.constant 0 : i32
    return %arg0, %arg1, %c0_i32, %c0_i32_0 : i32, i32, i32, i32
  }
}

module attributes {stable_mosaic.version = 11 : i64} {
  func.func @_norm_glu_kernel(%arg0: i32, %arg1: i32, %arg2: memref<1x64x256xf32, #tpu.memory_space<vmem>>, %arg3: memref<1x1x256xf32, #tpu.memory_space<vmem>>, %arg4: memref<1x1x256xf32, #tpu.memory_space<vmem>>, %arg5: memref<1x64x128xf32, #tpu.memory_space<vmem>>) attributes {dimension_semantics = [#tpu.dimension_semantics<parallel>, #tpu.dimension_semantics<parallel>], iteration_bounds = array<i64: 2, 1>, scalar_prefetch = 0 : i64, scratch_operands = 0 : i64, tpu.core_type = #tpu.core_type<tc>, window_params = [{transform_indices = @transform_0, window_bounds = array<i64: 1, 64, 256>}, {transform_indices = @transform_1, window_bounds = array<i64: 1, 1, 256>}, {transform_indices = @transform_2, window_bounds = array<i64: 1, 1, 256>}, {transform_indices = @transform_3, window_bounds = array<i64: 1, 64, 128>}]} {
    %c0 = arith.constant 0 : index
    %c0_0 = arith.constant 0 : index
    %c0_1 = arith.constant 0 : index
    %0 = vector.load %arg2[%c0, %c0_0, %c0_1] : memref<1x64x256xf32, #tpu.memory_space<vmem>>, vector<1x64x256xf32>
    %1 = vector.shape_cast %0 : vector<1x64x256xf32> to vector<64x256xf32>
    %c0_2 = arith.constant 0 : index
    %c0_3 = arith.constant 0 : index
    %c0_4 = arith.constant 0 : index
    %2 = vector.load %arg3[%c0_2, %c0_3, %c0_4] : memref<1x1x256xf32, #tpu.memory_space<vmem>>, vector<1x1x256xf32>
    %3 = vector.shape_cast %2 : vector<1x1x256xf32> to vector<1x256xf32>
    %4 = vector.broadcast %3 : vector<1x256xf32> to vector<64x256xf32>
    %5 = arith.mulf %1, %4 : vector<64x256xf32>
    %c0_5 = arith.constant 0 : index
    %c0_6 = arith.constant 0 : index
    %c0_7 = arith.constant 0 : index
    %6 = vector.load %arg4[%c0_5, %c0_6, %c0_7] : memref<1x1x256xf32, #tpu.memory_space<vmem>>, vector<1x1x256xf32>
    %7 = vector.shape_cast %6 : vector<1x1x256xf32> to vector<1x256xf32>
    %8 = vector.broadcast %7 : vector<1x256xf32> to vector<64x256xf32>
    %9 = arith.addf %5, %8 : vector<64x256xf32>
    %10 = vector.extract_strided_slice %9 {offsets = [0, 0], sizes = [64, 128], strides = [1, 1]} : vector<64x256xf32> to vector<64x128xf32>
    %11 = vector.extract_strided_slice %9 {offsets = [0, 128], sizes = [64, 128], strides = [1, 1]} : vector<64x256xf32> to vector<64x128xf32>
    %12 = arith.negf %11 : vector<64x128xf32>
    %13 = math.exp %12 : vector<64x128xf32>
    %cst = arith.constant 1.000000e+00 : f32
    %14 = vector.broadcast %cst : f32 to vector<64x128xf32>
    %15 = arith.addf %14, %13 : vector<64x128xf32>
    %16 = arith.divf %14, %15 : vector<64x128xf32>
    %17 = arith.mulf %10, %16 : vector<64x128xf32>
    %c0_8 = arith.constant 0 : index
    %c0_9 = arith.constant 0 : index
    %c0_10 = arith.constant 0 : index
    %18 = vector.load %arg5[%c0_8, %c0_9, %c0_10] : memref<1x64x128xf32, #tpu.memory_space<vmem>>, vector<1x64x128xf32>
    %19 = vector.shape_cast %18 : vector<1x64x128xf32> to vector<64x128xf32>
    %20 = vector.shape_cast %17 : vector<64x128xf32> to vector<1x64x128xf32>
    tpu.vector_store %arg5[%c0_8, %c0_9, %c0_10], %20 {strides = array<i32>} : memref<1x64x128xf32, #tpu.memory_space<vmem>>, vector<1x64x128xf32>,
    return
  }
  func.func @transform_0(%arg0: i32, %arg1: i32) -> (i32, i32, i32) {
    %c0_i32 = arith.constant 0 : i32
    %c0_i32_0 = arith.constant 0 : i32
    return %arg0, %arg1, %c0_i32 : i32, i32, i32
  }
  func.func @transform_1(%arg0: i32, %arg1: i32) -> (i32, i32, i32) {
    %c0_i32 = arith.constant 0 : i32
    %c0_i32_0 = arith.constant 0 : i32
    %c0_i32_1 = arith.constant 0 : i32
    return %arg0, %c0_i32, %c0_i32_0 : i32, i32, i32
  }
  func.func @transform_2(%arg0: i32, %arg1: i32) -> (i32, i32, i32) {
    %c0_i32 = arith.constant 0 : i32
    %c0_i32_0 = arith.constant 0 : i32
    %c0_i32_1 = arith.constant 0 : i32
    return %arg0, %c0_i32, %c0_i32_0 : i32, i32, i32
  }
  func.func @transform_3(%arg0: i32, %arg1: i32) -> (i32, i32, i32) {
    %c0_i32 = arith.constant 0 : i32
    %c0_i32_0 = arith.constant 0 : i32
    return %arg0, %arg1, %c0_i32 : i32, i32, i32
  }
}

</mosaic_0001>

<bundles_post_ra>
// kernel: down_sample_generator.3
= control target key start
LH: loop header
LB: loop body
LE: loop exit
PB: predicated region body
PF: predicated region fallthrough
CT: control target
= control target key end

     0   :  { %s620_s12 = smov 0   ;;  %s622_s13 = smov 0   ;;  %s690_s0 = inlined_call_operand.vmem [shape: f32[2,64,256], index: 0, kind: input, shape index: {}]   ;;  %s691_s1 = inlined_call_operand.vmem [shape: f32[2,1,256], index: 1, kind: input, shape index: {}]   ;;  %s692_s2 = inlined_call_operand.vmem [shape: f32[2,1,256], index: 2, kind: input, shape index: {}]   ;;  %s693_s3 = inlined_call_operand.vmem [shape: f32[2,64,128], index: 3, kind: output, shape index: {}]  }
   0x1   :  { %s624_s14 = smov 0  }
   0x2 LB: > { %s25_s15 = sadd.s32 1, %s594_s13  ;;  %p501_p0 = scmp.ge.s32.totalorder %s598_s14, 1  ;;  %s598_s14 = sphi %s624_s14, %s13_s14   ;;  %s594_s13 = sphi %s622_s13, %s695_s13   ;;  %s590_s12 = sphi %s620_s12, %s694_s12  }
   0x3   : > { %p27_p1 = scmp.ge.s32.totalorder %s25_s15, 2  ;;  %p177_p2 = scmp.lt.s32.totalorder %s598_s14, 3 }
   0x5   : > { %s697_s15 = smov (%p27_p1, %s25_s15), 0  ;;  %p178_p3 = pnand %p501_p0, %p177_p2 }
   0x6   : > { %p219_p4 = scmp.lt.s32.totalorder (!%p178_p3), %s590_s12, 1 }
   0x7   : > { %181 = sbr.rel (%p178_p3) target bundleno = 66 (0x42), region = 32 }
   0xc   : > { %v265_v0 = vlaneseq  ;;  %s699_s12 = smov (!%p219_p4, %s590_s12), 1 }
   0xd   : > { %s518_s16 = sshll.u32 %s699_s12, 7  ;;  %s504_s17 = sshll.u32 %s699_s12, 1 }
   0xe   : > { %v640_v1 = vshrl.u32 %v265_v0, 7  ;;  %s648_s20 = scalar_lea.vmem %s690_s0, %s518_s16  ;;  %s232_s23 = scalar_lea.vmem %s691_s1, %s504_s17 }
   0xf   : > { %s236_s26 = scalar_lea.vmem %s692_s2, %s504_s17  ;;  %v248_v3 = vld [vmem:[%s648_s20 + $0x8] sm:$0xff]  ;;  %v263_v4 = vld [vmem:[%s232_s23] sm:$0x3]  ;;  %v250_v7 = vld [vmem:[%s648_s20 + $0x18] sm:$0xff]  ;;  %s519_s27 = sshll.u32 %s699_s12, 6 }
  0x10   : > { %v271_v2 = vsub.s32 1, %v640_v1  ;;  %v657_v6 = vld [vmem:[%s236_s26] sm:$0x3]  ;;  %v252_v9 = vld [vmem:[%s648_s20 + $0x28] sm:$0xff]  ;;  %v254_v12 = vld [vmem:[%s648_s20 + $0x38] sm:$0xff]  ;;  %v267_v41 = vsub.s32 0, %v640_v1  ;;  %s245_s30 = scalar_lea.vmem %s693_s3, %s519_s27 }
  0x11   : > { %v256_v15 = vld [vmem:[%s648_s20 + $0x48] sm:$0xff]  ;;  %v258_v18 = vld [vmem:[%s648_s20 + $0x58] sm:$0xff]  ;;  %v247_v52 = vld [vmem:[%s648_s20] sm:$0xff] }
  0x12   : > { %v272_v5 = vrot.slane %v263_v4, %v271_v2  ;;  %v300_v8 = vrot.slane %v657_v6, %v271_v2  ;;  %v260_v24 = vld [vmem:[%s648_s20 + $0x68] sm:$0xff]  ;;  %v262_v29 = vld [vmem:[%s648_s20 + $0x78] sm:$0xff]  ;;  %v268_v50 = vrot.slane %v263_v4, %v267_v41  ;;  %v249_v55 = vld [vmem:[%s648_s20 + $0x10] sm:$0xff]  ;;  %v296_v60 = vrot.slane %v657_v6, %v267_v41 }
  0x13   : > { %v251_v56 = vld [vmem:[%s648_s20 + $0x20] sm:$0xff]  ;;  %v253_v61 = vld [vmem:[%s648_s20 + $0x30] sm:$0xff] }
  0x14   : > { %v276_v10 = vmul.f32 %v272_v5, %v248_v3  ;;  %v278_v11 = vmul.f32 %v272_v5, %v250_v7  ;;  %v280_v13 = vmul.f32 %v272_v5, %v252_v9  ;;  %v282_v14 = vmul.f32 %v272_v5, %v254_v12  ;;  %v255_v63 = vld [vmem:[%s648_s20 + $0x40] sm:$0xff]  ;;  %v257_v2 = vld [vmem:[%s648_s20 + $0x50] sm:$0xff] }
  0x15   : > { %v284_v23 = vmul.f32 %v272_v5, %v256_v15  ;;  %v286_v27 = vmul.f32 %v272_v5, %v258_v18  ;;  %v288_v31 = vmul.f32 %v272_v5, %v260_v24  ;;  %v290_v35 = vmul.f32 %v272_v5, %v262_v29  ;;  %v259_v7 = vld [vmem:[%s648_s20 + $0x60] sm:$0xff] }
  0x16   : > { %v304_v16 = vadd.f32 %v300_v8, %v276_v10  ;;  %v306_v17 = vadd.f32 %v300_v8, %v278_v11  ;;  %v308_v19 = vadd.f32 %v300_v8, %v280_v13  ;;  %v310_v20 = vadd.f32 %v300_v8, %v282_v14  ;;  %v261_v11 = vld [vmem:[%s648_s20 + $0x70] sm:$0xff] }
  0x17   : > { %v312_v28 = vadd.f32 %v300_v8, %v284_v23  ;;  %v314_v30 = vadd.f32 %v300_v8, %v286_v27  ;;  %v316_v34 = vadd.f32 %v300_v8, %v288_v31  ;;  %v318_v37 = vadd.f32 %v300_v8, %v290_v35 }
  0x18   : > { %v508_v21 = vmul.f32 -1.442695, %v304_v16  ;;  %v509_v22 = vmul.f32 -1.442695, %v306_v17  ;;  %v510_v25 = vmul.f32 -1.442695, %v308_v19  ;;  %v275_v59 = vmul.f32 %v268_v50, %v247_v52 }
  0x19   : > { %v511_v26 = vmul.f32 -1.442695, %v310_v20  ;;  %v512_v32 = vmul.f32 -1.442695, %v312_v28  ;;  %v513_v33 = vmul.f32 -1.442695, %v314_v30  ;;  %v277_v62 = vmul.f32 %v268_v50, %v249_v55 }
  0x1a   : > { %544 = vpow2.f32 %v508_v21  ;;  %v514_v36 = vmul.f32 -1.442695, %v316_v34  ;;  %v515_v38 = vmul.f32 -1.442695, %v318_v37  ;;  %v279_v1 = vmul.f32 %v268_v50, %v251_v56 }
  0x1b   : > { %546 = vpow2.f32 %v509_v22  ;;  %v281_v3 = vmul.f32 %v268_v50, %v253_v61  ;;  %v303_v4 = vadd.f32 %v296_v60, %v275_v59  ;;  %v283_v5 = vmul.f32 %v268_v50, %v255_v63 }
  0x1c   : > { %548 = vpow2.f32 %v510_v25  ;;  %v305_v8 = vadd.f32 %v296_v60, %v277_v62  ;;  %v285_v9 = vmul.f32 %v268_v50, %v257_v2  ;;  %v307_v10 = vadd.f32 %v296_v60, %v279_v1 }
  0x1d   : > { %550 = vpow2.f32 %v511_v26  ;;  %v309_v6 = vadd.f32 %v296_v60, %v281_v3  ;;  %v287_v13 = vmul.f32 %v268_v50, %v259_v7  ;;  %v311_v16 = vadd.f32 %v296_v60, %v283_v5 }
  0x1e   : > { %552 = vpow2.f32 %v512_v32  ;;  %v313_v19 = vadd.f32 %v296_v60, %v285_v9  ;;  %v289_v20 = vmul.f32 %v268_v50, %v261_v11 }
  0x1f   : > { %554 = vpow2.f32 %v513_v33  ;;  %v315_v25 = vadd.f32 %v296_v60, %v287_v13 }
  0x20   : > { %556 = vpow2.f32 %v514_v36  ;;  %v317_v29 = vadd.f32 %v296_v60, %v289_v20 }
  0x21   : > { %558 = vpow2.f32 %v515_v38 }
  0x27   : > { %v545_v39 = vpop.eup %544 }
  0x28   : > { %v547_v40 = vpop.eup %546  ;;  %v343_v42 = vadd.f32 1.0, %v545_v39 }
  0x29   : > { %v549_v43 = vpop.eup %548  ;;  %v344_v44 = vadd.f32 1.0, %v547_v40 }
  0x2a   : > { %v551_v45 = vpop.eup %550  ;;  %560 = vrcp.f32 %v343_v42  ;;  %v345_v46 = vadd.f32 1.0, %v549_v43 }
  0x2b   : > { %v553_v47 = vpop.eup %552  ;;  %562 = vrcp.f32 %v344_v44  ;;  %v346_v48 = vadd.f32 1.0, %v551_v45 }
  0x2c   : > { %v555_v49 = vpop.eup %554  ;;  %564 = vrcp.f32 %v345_v46  ;;  %v347_v51 = vadd.f32 1.0, %v553_v47 }
  0x2d   : > { %566 = vrcp.f32 %v346_v48  ;;  %v348_v53 = vadd.f32 1.0, %v555_v49  ;;  %v557_v54 = vpop.eup %556 }
  0x2e   : > { %568 = vrcp.f32 %v347_v51  ;;  %v349_v57 = vadd.f32 1.0, %v557_v54  ;;  %v559_v58 = vpop.eup %558 }
  0x2f   : > { %570 = vrcp.f32 %v348_v53  ;;  %v350_v0 = vadd.f32 1.0, %v559_v58 }
  0x30   : > { %572 = vrcp.f32 %v349_v57 }
  0x31   : > { %574 = vrcp.f32 %v350_v0 }
  0x37   : > { %v561_v12 = vpop.eup %560 }
  0x38   : > { %v563_v14 = vpop.eup %562  ;;  %v367_v15 = vmul.f32 %v561_v12, %v303_v4 }
  0x39   : > { %v565_v17 = vpop.eup %564  ;;  %v368_v18 = vmul.f32 %v563_v14, %v305_v8 }
  0x3a   : > { %v567_v21 = vpop.eup %566  ;;  %375 = vst [vmem:[%s245_s30] sm:$0xff] %v367_v15  ;;  %v369_v22 = vmul.f32 %v565_v17, %v307_v10 }
  0x3b   : > { %v569_v23 = vpop.eup %568  ;;  %376 = vst [vmem:[%s245_s30 + $0x8] sm:$0xff] %v368_v18  ;;  %v370_v24 = vmul.f32 %v567_v21, %v309_v6 }
  0x3c   : > { %v571_v26 = vpop.eup %570  ;;  %377 = vst [vmem:[%s245_s30 + $0x10] sm:$0xff] %v369_v22  ;;  %v371_v27 = vmul.f32 %v569_v23, %v311_v16 }
  0x3d   : > { %378 = vst [vmem:[%s245_s30 + $0x18] sm:$0xff] %v370_v24  ;;  %v372_v28 = vmul.f32 %v571_v26, %v313_v19  ;;  %v573_v30 = vpop.eup %572 }
  0x3e   : > { %379 = vst [vmem:[%s245_s30 + $0x20] sm:$0xff] %v371_v27  ;;  %v373_v31 = vmul.f32 %v573_v30, %v315_v25  ;;  %v575_v32 = vpop.eup %574 }
  0x3f   : > { %380 = vst [vmem:[%s245_s30 + $0x28] sm:$0xff] %v372_v28  ;;  %v374_v33 = vmul.f32 %v575_v32, %v317_v29 }
  0x40   : > { %381 = vst [vmem:[%s245_s30 + $0x30] sm:$0xff] %v373_v31 }
  0x41   : > { %382 = vst [vmem:[%s245_s30 + $0x38] sm:$0xff] %v374_v33 }
  0x42 PF: > { %s13_s14 = sadd.s32 1, %s598_s14   ;;  %s694_s12 = smov %s594_s13 }
  0x43   : > { %p10_p5 = scmp.ge.s32.totalorder %s13_s14, 4   ;;  %s695_s13 = smov %s697_s15 }
  0x45   :  { %12 = sbr.rel (!%p10_p5) target bundleno = 2 (0x2), region = 68 }

// kernel: down_sample_generator.2
= control target key start
LH: loop header
LB: loop body
LE: loop exit
PB: predicated region body
PF: predicated region fallthrough
CT: control target
= control target key end

     0   :  { %s867_s12 = smov 0   ;;  %s869_s13 = smov 0   ;;  %s1036_s0 = inlined_call_operand.vmem [shape: f32[2,64,128], index: 0, kind: input, shape index: {}]   ;;  %s1037_s1 = inlined_call_operand.vmem [shape: f32[128,256], index: 1, kind: input, shape index: {}]   ;;  %s1038_s2 = inlined_call_operand.vmem [shape: f32[2,64,256], index: 2, kind: output, shape index: {0}]   ;;  %s1039_s3 = inlined_call_operand.vmem [shape: f32[2,1,8,256], index: 3, kind: output, shape index: {1}]  }
   0x1   :  { %s871_s14 = smov 0  }
   0x2 LB: > { %s33_s15 = sadd.s32 1, %s840_s13  ;;  %p753_p0 = scmp.ge.s32.totalorder %s844_s14, 1  ;;  %s844_s14 = sphi %s871_s14, %s14_s14   ;;  %s840_s13 = sphi %s869_s13, %s1041_s13   ;;  %s836_s12 = sphi %s867_s12, %s1040_s12  }
   0x3   : > { %p35_p1 = scmp.ge.s32.totalorder %s33_s15, 2  ;;  %p175_p2 = scmp.lt.s32.totalorder %s844_s14, 3 }
   0x5   : > { %s1043_s15 = smov (%p35_p1, %s33_s15), 0  ;;  %p176_p3 = pnand %p753_p0, %p175_p2 }
   0x6   : > { %p221_p4 = scmp.lt.s32.totalorder (!%p176_p3), %s836_s12, 1 }
   0x7   : > { %179 = sbr.rel (%p176_p3) target bundleno = 279 (0x117), region = 28 }
   0xc   : > { %v290_v0 = vld [vmem:[%s1037_s1 + $0xf8] sm:$0xff]  ;;  %v289_v1 = vld [vmem:[%s1037_s1 + $0xf0] sm:$0xff]  ;;  %v288_v2 = vld [vmem:[%s1037_s1 + $0xe8] sm:$0xff]  ;;  %s1045_s12 = smov (!%p221_p4, %s836_s12), 1  ;;  %v846_v30 = vmov 0.0   ;;  %vm571_vm0 = vcmask 1040384  }
   0xd   : > { %299 = vmatprep.subr.mxu0 %v290_v0  ;;  %v287_v3 = vld [vmem:[%s1037_s1 + $0xe0] sm:$0xff]  ;;  %765 = vmatprep.subr.mxu1 %v290_v0  ;;  %v286_v4 = vld [vmem:[%s1037_s1 + $0xd8] sm:$0xff]  ;;  %v285_v5 = vld [vmem:[%s1037_s1 + $0xd0] sm:$0xff]  ;;  %s762_s24 = sshll.u32 %s1045_s12, 6  ;;  %s763_s11 = sshll.u32 %s1045_s12, 7  ;;  %vm574_vm1 = vcmask 1041408  }
   0xe   : > { %300 = vmatpush1.msra.mxu0 %v289_v1  ;;  %781 = vmatpush1.msra.mxu1 %v289_v1  ;;  %v284_v6 = vld [vmem:[%s1037_s1 + $0xc8] sm:$0xff]  ;;  %v283_v7 = vld [vmem:[%s1037_s1 + $0xc0] sm:$0xff]  ;;  %v282_v8 = vld [vmem:[%s1037_s1 + $0xb8] sm:$0xff]  ;;  %s985_s6 = scalar_lea.vmem %s1036_s0, %s762_s24  ;;  %s1005_s18 = scalar_lea.vmem %s1038_s2, %s763_s11 }
   0xf   : > { %301 = vmatprep.subr.mxu0 %v288_v2  ;;  %766 = vmatprep.subr.mxu1 %v288_v2  ;;  %v281_v9 = vld [vmem:[%s1037_s1 + $0xb0] sm:$0xff]  ;;  %v280_v10 = vld [vmem:[%s1037_s1 + $0xa8] sm:$0xff]  ;;  %v279_v11 = vld [vmem:[%s1037_s1 + $0xa0] sm:$0xff]  ;;  %s764_s19 = sshll.u32 %s1045_s12, 4 }
  0x10   : > { %302 = vmatpush1.msra.mxu0 %v287_v3  ;;  %782 = vmatpush1.msra.mxu1 %v287_v3  ;;  %v278_v12 = vld [vmem:[%s1037_s1 + $0x98] sm:$0xff]  ;;  %v277_v13 = vld [vmem:[%s1037_s1 + $0x90] sm:$0xff]  ;;  %v276_v14 = vld [vmem:[%s1037_s1 + $0x88] sm:$0xff]  ;;  %s252_s22 = scalar_lea.vmem %s1039_s3, %s764_s19 }
  0x11   : > { %303 = vmatprep.subr.mxu0 %v286_v4  ;;  %767 = vmatprep.subr.mxu1 %v286_v4  ;;  %v275_v15 = vld [vmem:[%s1037_s1 + $0x80] sm:$0xff]  ;;  %v274_v16 = vld [vmem:[%s1037_s1 + $0x78] sm:$0xff]  ;;  %v273_v17 = vld [vmem:[%s1037_s1 + $0x70] sm:$0xff] }
  0x12   : > { %304 = vmatpush1.msra.mxu0 %v285_v5  ;;  %783 = vmatpush1.msra.mxu1 %v285_v5  ;;  %v272_v18 = vld [vmem:[%s1037_s1 + $0x68] sm:$0xff]  ;;  %v271_v19 = vld [vmem:[%s1037_s1 + $0x60] sm:$0xff]  ;;  %v270_v20 = vld [vmem:[%s1037_s1 + $0x58] sm:$0xff] }
  0x13   : > { %305 = vmatprep.subr.mxu0 %v284_v6  ;;  %768 = vmatprep.subr.mxu1 %v284_v6  ;;  %v269_v21 = vld [vmem:[%s1037_s1 + $0x50] sm:$0xff]  ;;  %v268_v22 = vld [vmem:[%s1037_s1 + $0x48] sm:$0xff]  ;;  %v267_v23 = vld [vmem:[%s1037_s1 + $0x40] sm:$0xff] }
  0x14   : > { %306 = vmatpush1.msra.mxu0 %v283_v7  ;;  %784 = vmatpush1.msra.mxu1 %v283_v7  ;;  %v266_v24 = vld [vmem:[%s1037_s1 + $0x38] sm:$0xff]  ;;  %v265_v25 = vld [vmem:[%s1037_s1 + $0x30] sm:$0xff]  ;;  %v264_v26 = vld [vmem:[%s1037_s1 + $0x28] sm:$0xff] }
  0x15   : > { %307 = vmatprep.subr.mxu0 %v282_v8  ;;  %769 = vmatprep.subr.mxu1 %v282_v8  ;;  %v263_v27 = vld [vmem:[%s1037_s1 + $0x20] sm:$0xff]  ;;  %v262_v28 = vld [vmem:[%s1037_s1 + $0x18] sm:$0xff]  ;;  %v261_v29 = vld [vmem:[%s1037_s1 + $0x10] sm:$0xff] }
  0x16   : > { %308 = vmatpush1.msra.mxu0 %v281_v9  ;;  %785 = vmatpush1.msra.mxu1 %v281_v9  ;;  %v260_v31 = vld [vmem:[%s1037_s1 + $0x8] sm:$0xff]  ;;  %v259_v32 = vld [vmem:[%s1037_s1] sm:$0xff]  ;;  %v293_v37 = vld [vmem:[%s985_s6 + $0x10] sm:$0xff] }
  0x17   : > { %309 = vmatprep.subr.mxu0 %v280_v10  ;;  %770 = vmatprep.subr.mxu1 %v280_v10  ;;  %v291_v33 = vld [vmem:[%s985_s6] sm:$0xff]  ;;  %v292_v35 = vld [vmem:[%s985_s6 + $0x8] sm:$0xff]  ;;  %v297_v38 = vld [vmem:[%s985_s6 + $0x30] sm:$0xff] }
  0x18   : > { %310 = vmatpush1.msra.mxu0 %v279_v11  ;;  %786 = vmatpush1.msra.mxu1 %v279_v11  ;;  %v295_v34 = vld [vmem:[%s985_s6 + $0x20] sm:$0xff]  ;;  %v296_v36 = vld [vmem:[%s985_s6 + $0x28] sm:$0xff]  ;;  %v294_v39 = vld [vmem:[%s985_s6 + $0x18] sm:$0xff] }
  0x19   : > { %311 = vmatprep.subr.mxu0 %v278_v12  ;;  %771 = vmatprep.subr.mxu1 %v278_v12  ;;  %v298_v40 = vld [vmem:[%s985_s6 + $0x38] sm:$0xff] }
  0x1a   : > { %312 = vmatpush1.msra.mxu0 %v277_v13  ;;  %787 = vmatpush1.msra.mxu1 %v277_v13 }
  0x1b   : > { %313 = vmatprep.subr.mxu0 %v276_v14  ;;  %772 = vmatprep.subr.mxu1 %v276_v14 }
  0x1c   : > { %314 = vmatpush1.msra.mxu0 %v275_v15  ;;  %788 = vmatpush1.msra.mxu1 %v275_v15 }
  0x1d   : > { %315 = vmatprep.subr.mxu0 %v274_v16  ;;  %773 = vmatprep.subr.mxu1 %v274_v16 }
  0x1e   : > { %316 = vmatpush1.msra.mxu0 %v273_v17  ;;  %789 = vmatpush1.msra.mxu1 %v273_v17 }
  0x1f   : > { %317 = vmatprep.subr.mxu0 %v272_v18  ;;  %774 = vmatprep.subr.mxu1 %v272_v18 }
  0x20   : > { %318 = vmatpush1.msra.mxu0 %v271_v19  ;;  %790 = vmatpush1.msra.mxu1 %v271_v19 }
  0x21   : > { %319 = vmatprep.subr.mxu0 %v270_v20  ;;  %775 = vmatprep.subr.mxu1 %v270_v20 }
  0x22   : > { %320 = vmatpush1.msra.mxu0 %v269_v21  ;;  %791 = vmatpush1.msra.mxu1 %v269_v21 }
  0x23   : > { %321 = vmatprep.subr.mxu0 %v268_v22  ;;  %776 = vmatprep.subr.mxu1 %v268_v22 }
  0x24   : > { %322 = vmatpush1.msra.mxu0 %v267_v23  ;;  %792 = vmatpush1.msra.mxu1 %v267_v23 }
  0x25   : > { %323 = vmatprep.subr.mxu0 %v266_v24  ;;  %777 = vmatprep.subr.mxu1 %v266_v24 }
  0x26   : > { %324 = vmatpush1.msra.mxu0 %v265_v25  ;;  %793 = vmatpush1.msra.mxu1 %v265_v25 }
  0x27   : > { %325 = vmatprep.subr.mxu0 %v264_v26  ;;  %363 = vmatprep.mubr.f32.mxu0 %v846_v30 }
  0x28   : > { %326 = vmatpush1.msra.mxu0 %v263_v27  ;;  %778 = vmatprep.subr.mxu1 %v264_v26 }
  0x29   : > { %327 = vmatprep.subr.mxu0 %v262_v28  ;;  %794 = vmatpush1.msra.mxu1 %v263_v27 }
  0x2a   : > { %328 = vmatpush1.msra.mxu0 %v261_v29  ;;  %779 = vmatprep.subr.mxu1 %v262_v28 }
  0x2b   : > { %329 = vmatprep.subr.mxu0 %v260_v31  ;;  %795 = vmatpush1.msra.mxu1 %v261_v29 }
  0x2c   : > { %330 = vmatpush1.msra.mxu0 %v259_v32  ;;  %780 = vmatprep.subr.mxu1 %v260_v31 }
  0x2d   : > { %364 = vmatmul.mubr.f32.vlgmr.msra.gmra.mxu0 %v291_v33  ;;  %796 = vmatpush1.msra.mxu1 %v259_v32 }
  0x2e   : > { %369 = vmatprep.mubr.f32.mxu0 %v846_v30  ;;  %387 = vmatprep.mubr.f32.mxu1 %v846_v30 }
  0x2f   : > { %388 = vmatmul.mubr.f32.vlgmr.msra.gmra.mxu1 %v295_v34 }
  0x30   : > { %393 = vmatprep.mubr.f32.mxu1 %v846_v30 }
  0x31   : > { %370 = vmatmul.mubr.f32.gmra.mxu0 %v292_v35 }
  0x32   : > { %375 = vmatprep.mubr.f32.mxu0 %v846_v30 }
  0x33   : > { %394 = vmatmul.mubr.f32.gmra.mxu1 %v296_v36 }
  0x34   : > { %399 = vmatprep.mubr.f32.mxu1 %v846_v30 }
  0x35   : > { %376 = vmatmul.mubr.f32.gmra.mxu0 %v293_v37 }
  0x36   : > { %381 = vmatprep.mubr.f32.mxu0 %v846_v30 }
  0x37   : > { %400 = vmatmul.mubr.f32.gmra.mxu1 %v297_v38 }
  0x38   : > { %405 = vmatprep.mubr.f32.mxu1 %v846_v30 }
  0x39   : > { %382 = vmatmul.mubr.f32.gmra.mxu0 %v294_v39 }
  0x3b   : > { %406 = vmatmul.mubr.f32.gmra.mxu1 %v298_v40 }
  0xed   : > { %v365_v41 = vpop.f32.mrf.mxu0 }
  0xee   : > { %579 = vst [vmem:[%s1005_s18] sm:$0xff] %v365_v41  ;;  %v529_v52 = vmul.f32 %v365_v41, %v365_v41 }
  0xef   : > { %v367_v42 = vpop.f32.mrf.mxu0  ;;  %v389_v43 = vpop.f32.mrf.mxu1 }
  0xf0   : > { %580 = vst [vmem:[%s1005_s18 + $0x8] sm:$0xff] %v367_v42  ;;  %587 = vst [vmem:[%s1005_s18 + $0x40] sm:$0xff] %v389_v43  ;;  %v530_v55 = vmul.f32 %v367_v42, %v367_v42  ;;  %v537_v5 = vmul.f32 %v389_v43, %v389_v43 }
  0xf1   : > { %v371_v44 = vpop.f32.mrf.mxu0  ;;  %v391_v45 = vpop.f32.mrf.mxu1 }
  0xf2   : > { %581 = vst [vmem:[%s1005_s18 + $0x10] sm:$0xff] %v371_v44  ;;  %588 = vst [vmem:[%s1005_s18 + $0x48] sm:$0xff] %v391_v45  ;;  %v531_v48 = vmul.f32 %v371_v44, %v371_v44  ;;  %v503_v53 = vadd.f32 %v371_v44, %v365_v41  ;;  %v538_v13 = vmul.f32 %v391_v45, %v391_v45 }
  0xf3   : > { %v373_v46 = vpop.f32.mrf.mxu0  ;;  %v395_v47 = vpop.f32.mrf.mxu1 }
  0xf4   : > { %582 = vst [vmem:[%s1005_s18 + $0x18] sm:$0xff] %v373_v46  ;;  %589 = vst [vmem:[%s1005_s18 + $0x50] sm:$0xff] %v395_v47  ;;  %v532_v49 = vmul.f32 %v373_v46, %v373_v46  ;;  %v545_v58 = vadd.f32 %v531_v48, %v529_v52  ;;  %v516_v59 = vadd.f32 %v373_v46, %v367_v42 }
  0xf5   : > { %v377_v50 = vpop.f32.mrf.mxu0  ;;  %v397_v51 = vpop.f32.mrf.mxu1  ;;  %v539_v14 = vmul.f32 %v395_v47, %v395_v47 }
  0xf6   : > { %v533_v54 = vmul.f32 %v377_v50, %v377_v50  ;;  %583 = vst [vmem:[%s1005_s18 + $0x20] sm:$0xff] %v377_v50  ;;  %590 = vst [vmem:[%s1005_s18 + $0x58] sm:$0xff] %v397_v51  ;;  %v504_v60 = vadd.f32 %v503_v53, %v377_v50  ;;  %v558_v62 = vadd.f32 %v532_v49, %v530_v55 }
  0xf7   : > { %v379_v56 = vpop.f32.mrf.mxu0  ;;  %v401_v57 = vpop.f32.mrf.mxu1  ;;  %v540_v20 = vmul.f32 %v397_v51, %v397_v51 }
  0xf8   : > { %v534_v61 = vmul.f32 %v379_v56, %v379_v56  ;;  %584 = vst [vmem:[%s1005_s18 + $0x28] sm:$0xff] %v379_v56  ;;  %591 = vst [vmem:[%s1005_s18 + $0x60] sm:$0xff] %v401_v57  ;;  %v546_v1 = vadd.f32 %v545_v58, %v533_v54  ;;  %v517_v2 = vadd.f32 %v516_v59, %v379_v56 }
  0xf9   : > { %v383_v63 = vpop.f32.mrf.mxu0  ;;  %v403_v0 = vpop.f32.mrf.mxu1  ;;  %v541_v21 = vmul.f32 %v401_v57, %v401_v57 }
  0xfa   : > { %v505_v3 = vadd.f32 %v504_v60, %v383_v63  ;;  %v535_v4 = vmul.f32 %v383_v63, %v383_v63  ;;  %585 = vst [vmem:[%s1005_s18 + $0x30] sm:$0xff] %v383_v63  ;;  %592 = vst [vmem:[%s1005_s18 + $0x68] sm:$0xff] %v403_v0  ;;  %v559_v6 = vadd.f32 %v558_v62, %v534_v61 }
  0xfb   : > { %v385_v7 = vpop.f32.mrf.mxu0  ;;  %v407_v8 = vpop.f32.mrf.mxu1  ;;  %v542_v27 = vmul.f32 %v403_v0, %v403_v0 }
  0xfc   : > { %v506_v9 = vadd.f32 %v505_v3, %v389_v43  ;;  %v547_v10 = vadd.f32 %v546_v1, %v535_v4  ;;  %v518_v11 = vadd.f32 %v517_v2, %v385_v7  ;;  %v536_v12 = vmul.f32 %v385_v7, %v385_v7  ;;  %586 = vst [vmem:[%s1005_s18 + $0x38] sm:$0xff] %v385_v7 }
  0xfd   : > { %593 = vst [vmem:[%s1005_s18 + $0x70] sm:$0xff] %v407_v8  ;;  %v409_v15 = vpop.f32.mrf.mxu1  ;;  %v543_v22 = vmul.f32 %v407_v8, %v407_v8 }
  0xfe   : > { %v548_v16 = vadd.f32 %v547_v10, %v537_v5  ;;  %v519_v17 = vadd.f32 %v518_v11, %v391_v45  ;;  %v560_v18 = vadd.f32 %v559_v6, %v536_v12  ;;  %v507_v19 = vadd.f32 %v506_v9, %v395_v47  ;;  %594 = vst [vmem:[%s1005_s18 + $0x78] sm:$0xff] %v409_v15 }
  0xff   : > { %v544_v32 = vmul.f32 %v409_v15, %v409_v15 }
 0x100   : > { %v561_v23 = vadd.f32 %v560_v18, %v538_v13  ;;  %v508_v24 = vadd.f32 %v507_v19, %v401_v57  ;;  %v549_v25 = vadd.f32 %v548_v16, %v539_v14  ;;  %v520_v26 = vadd.f32 %v519_v17, %v397_v51 }
 0x102   : > { %v550_v28 = vadd.f32 %v549_v25, %v541_v21  ;;  %v521_v29 = vadd.f32 %v520_v26, %v403_v0  ;;  %v562_v30 = vadd.f32 %v561_v23, %v540_v20  ;;  %v509_v31 = vadd.f32 %v508_v24, %v407_v8 }
 0x104   : > { %v563_v33 = vadd.f32 %v562_v30, %v542_v27  ;;  %v510_v34 = vrot.slane %v509_v31, 4  ;;  %v551_v35 = vadd.f32 %v550_v28, %v543_v22  ;;  %v522_v36 = vadd.f32 %v521_v29, %v409_v15 }
 0x106   : > { %v511_v37 = vadd.f32 %v510_v34, %v509_v31  ;;  %v552_v38 = vrot.slane %v551_v35, 4  ;;  %v523_v39 = vrot.slane %v522_v36, 4  ;;  %v564_v40 = vadd.f32 %v563_v33, %v544_v32 }
 0x108   : > { %v512_v41 = vrot.slane %v511_v37, 2  ;;  %v553_v42 = vadd.f32 %v552_v38, %v551_v35  ;;  %v524_v43 = vadd.f32 %v523_v39, %v522_v36  ;;  %v565_v44 = vrot.slane %v564_v40, 4 }
 0x10a   : > { %v513_v45 = vadd.f32 %v512_v41, %v511_v37  ;;  %v554_v46 = vrot.slane %v553_v42, 2  ;;  %v525_v47 = vrot.slane %v524_v43, 2  ;;  %v566_v48 = vadd.f32 %v565_v44, %v564_v40 }
 0x10c   : > { %v514_v49 = vrot.slane %v513_v45, 1  ;;  %v555_v50 = vadd.f32 %v554_v46, %v553_v42  ;;  %v526_v51 = vadd.f32 %v525_v47, %v524_v43  ;;  %v567_v52 = vrot.slane %v566_v48, 2 }
 0x10e   : > { %v556_v53 = vrot.slane %v555_v50, 1  ;;  %v527_v54 = vrot.slane %v526_v51, 1  ;;  %v568_v55 = vadd.f32 %v567_v52, %v566_v48  ;;  %v515_v56 = vadd.f32 %v514_v49, %v513_v45 }
 0x110   : > { %v557_v57 = vadd.f32 %v556_v53, %v555_v50  ;;  %v569_v58 = vrot.slane %v568_v55, 1  ;;  %v528_v60 = vadd.f32 %v527_v54, %v526_v51 }
 0x112   : > { %v572_v59 = vsel %vm571_vm0, %v515_v56, %v557_v57  ;;  %v570_v61 = vadd.f32 %v569_v58, %v568_v55 }
 0x113   : > { %v575_v62 = vsel %vm574_vm1, %v572_v59, 0.0 }
 0x114   : > { %v573_v63 = vsel %vm571_vm0, %v528_v60, %v570_v61  ;;  %577 = vst [vmem:[%s252_s22] sm:$0xff] %v575_v62 }
 0x115   : > { %v576_v0 = vsel %vm574_vm1, %v573_v63, 0.0 }
 0x116   : > { %578 = vst [vmem:[%s252_s22 + $0x8] sm:$0xff] %v576_v0 }
 0x117 PF: > { %s14_s14 = sadd.s32 1, %s844_s14   ;;  %s1040_s12 = smov %s840_s13 }
 0x118   : > { %p11_p5 = scmp.ge.s32.totalorder %s14_s14, 4   ;;  %s1041_s13 = smov %s1043_s15 }
 0x11a   :  { %13 = sbr.rel (!%p11_p5) target bundleno = 2 (0x2), region = 83 }

</bundles_post_ra>
